<compile_context>
chip_gen: v5e
topology: v5e:2x2
jax: 0.10.0
libtpu: 0.0.40
codegen_flags: <defaults>
</compile_context>

<pallas_src>
import functools

import jax
import jax.numpy as jnp
from jax.experimental import pallas as pl
from jax.experimental.pallas import tpu as pltpu


def _round_up(x, m):
    return (x + m - 1) // m * m


def _generator_kernel(num_cont, cat_dims, inv_tau, out_pad,
                      x_ref, w1_ref, b1_ref, w2_ref, b2_ref, g_ref, segmat_ref,
                      out_ref):
    # dense1 + relu (f32 accumulation on the MXU)
    h = jnp.dot(x_ref[...], w1_ref[...], preferred_element_type=jnp.float32)
    h = jnp.maximum(h + b1_ref[...], 0.0)

    # fused head matmul: columns = [dense_num_ | dense_cat_[k0] | dense_cat_[k1] | ... | pad]
    z = jnp.dot(h.astype(w2_ref.dtype), w2_ref[...],
                preferred_element_type=jnp.float32) + b2_ref[...]

    # static lane masks (cheap VPU compares, no cross-lane data movement)
    lane = jax.lax.broadcasted_iota(jnp.int32, (1, out_pad), 1)
    total_cat = sum(cat_dims)
    cont_mask = lane < num_cont
    cat_mask = (lane >= num_cont) & (lane < num_cont + total_cat)

    # gumbel-softmax logits, full width; pad/continuous lanes masked below.
    # inv_tau multiply instead of a divide.
    y = (z + g_ref[...]) * inv_tau

    neg = jnp.float32(-1e30)

    # per-head max assembled into one full-width vector (no lane-unaligned slices,
    # constant number of XLU reductions since the head list is static)
    m_cols = jnp.zeros_like(y)
    off = num_cont
    for dim in cat_dims:
        hm = (lane >= off) & (lane < off + dim)
        mk = jnp.max(jnp.where(hm, y, neg), axis=-1, keepdims=True)
        m_cols = jnp.where(hm, mk, m_cols)
        off += dim

    # masked exp (pad + continuous lanes -> exp(-1e30) == 0), then the
    # segmented per-head sum via one small MXU matmul against the
    # block-diagonal segment matrix: column j of seg_sum = sum of j's head.
    e = jnp.exp(jnp.where(cat_mask, y - m_cols, neg))
    seg_sum = jnp.dot(e, segmat_ref[...], preferred_element_type=jnp.float32)
    denom = jnp.where(cat_mask, seg_sum, 1.0)

    # EUP approximate reciprocal + two Newton refinements -> f32-accurate,
    # no VALU divide.
    r = pl.reciprocal(denom, approx=True)
    r = r * (2.0 - denom * r)
    r = r * (2.0 - denom * r)
    soft = e * r

    # single unmasked lane-dense store: relu on continuous lanes,
    # gumbel-softmax on categorical lanes, zeros on pad lanes.
    out_ref[...] = jnp.where(cont_mask, jnp.maximum(z, 0.0), soft)


def generator_forward(x, w1, b1, w2, b2, gumbel, *, num_cont, cat_dims, tau,
                      matmul_dtype=jnp.float32, tile_b=None):
    """x:(B,D)  w1:(D,D)  b1:(1,D)  w2:(D,O)  b2:(1,O)  gumbel:(B,O) -> (B,O) f32."""
    cat_dims = tuple(int(d) for d in cat_dims)
    B, D = x.shape
    out_dim = num_cont + sum(cat_dims)

    # lane-dense padded layout
    d_pad = _round_up(D, 128)
    o_pad = _round_up(out_dim, 128)
    if tile_b is None:
        tile_b = min(256, _round_up(B, 8))   # f32 sublane multiple of 8
    b_pad = _round_up(B, tile_b)

    f32 = jnp.float32
    xp = jnp.zeros((b_pad, d_pad), f32).at[:B, :D].set(x).astype(matmul_dtype)
    w1p = jnp.zeros((d_pad, d_pad), f32).at[:D, :D].set(w1).astype(matmul_dtype)
    b1p = jnp.zeros((1, d_pad), f32).at[:, :D].set(b1)
    w2p = jnp.zeros((d_pad, o_pad), f32).at[:D, :out_dim].set(w2).astype(matmul_dtype)
    b2p = jnp.zeros((1, o_pad), f32).at[:, :out_dim].set(b2)
    gp = jnp.zeros((b_pad, o_pad), f32).at[:B, :out_dim].set(gumbel)

    # block-diagonal segment matrix: segmat[i, j] = 1 iff lanes i, j belong to
    # the same categorical head (used for the in-kernel segmented softmax sum).
    seg = -jnp.ones((o_pad,), jnp.int32)
    off = num_cont
    for k, dim in enumerate(cat_dims):
        seg = seg.at[off:off + dim].set(k)
        off += dim
    segmat = ((seg[:, None] == seg[None, :]) & (seg[:, None] >= 0)).astype(f32)

    kernel = functools.partial(_generator_kernel, num_cont, cat_dims,
                               float(1.0 / tau), o_pad)

    # VMEM budget (keep explicit and conservative for v7x's 64 MiB per TC):
    # double-buffered x / gumbel / output tiles + resident weights.
    itemsize = jnp.dtype(matmul_dtype).itemsize
    est = (2 * tile_b * d_pad * itemsize       # x tiles (pipelined)
           + 2 * tile_b * o_pad * 4            # gumbel tiles
           + 2 * tile_b * o_pad * 4            # output tiles
           + d_pad * d_pad * itemsize          # resident w1
           + d_pad * o_pad * itemsize          # resident w2
           + o_pad * o_pad * 4                 # resident segment matrix
           + d_pad * 4 + o_pad * 4)            # biases
    vmem_limit = int(min(56 * 1024 * 1024, max(4 * est, 16 * 1024 * 1024)))

    out = pl.pallas_call(
        kernel,
        out_shape=jax.ShapeDtypeStruct((b_pad, o_pad), f32),
        grid=(b_pad // tile_b,),
        in_specs=[
            pl.BlockSpec((tile_b, d_pad), lambda i: (i, 0)),   # x (batch-tiled)
            pl.BlockSpec((d_pad, d_pad), lambda i: (0, 0)),    # w1 (resident)
            pl.BlockSpec((1, d_pad), lambda i: (0, 0)),        # b1 (resident)
            pl.BlockSpec((d_pad, o_pad), lambda i: (0, 0)),    # w2 (resident)
            pl.BlockSpec((1, o_pad), lambda i: (0, 0)),        # b2 (resident)
            pl.BlockSpec((tile_b, o_pad), lambda i: (i, 0)),   # gumbel (batch-tiled)
            pl.BlockSpec((o_pad, o_pad), lambda i: (0, 0)),    # segment matrix (resident)
        ],
        out_specs=pl.BlockSpec((tile_b, o_pad), lambda i: (i, 0)),
        compiler_params=pltpu.CompilerParams(
            dimension_semantics=("parallel",),    # split batch tiles across TCs on v7x
            vmem_limit_bytes=vmem_limit,
        ),
    )(xp, w1p, b1p, w2p, b2p, gp, segmat)

    return out[:B, :out_dim]


def generator_reference(x, w1, b1, w2, b2, gumbel, *, num_cont, cat_dims, tau):
    h = jnp.maximum(x @ w1 + b1, 0.0)
    z = h @ w2 + b2
    outs = [jnp.maximum(z[:, :num_cont], 0.0)]
    off = num_cont
    for dim in cat_dims:
        y = (z[:, off:off + dim] + gumbel[:, off:off + dim]) / tau
        outs.append(jax.nn.softmax(y, axis=-1))
        off += dim
    return jnp.concatenate(outs, axis=-1)


if __name__ == "__main__":
    key = jax.random.PRNGKey(0)

    # module config (small, consistent with the PyTorch __init__)
    input_dims = 32
    continuous_cols = ["c0", "c1", "c2", "c3"]           # 4 continuous columns
    discrete_cols = {"d0": 8, "d1": 16}                   # two categorical heads
    tau = 0.2
    batch = 8

    num_cont = len(continuous_cols)
    cat_dims = tuple(discrete_cols.values())
    out_dim = num_cont + sum(cat_dims)

    keys = jax.random.split(key, 6)
    x = jax.random.normal(keys[0], (batch, input_dims), jnp.float32)
    w1 = jax.random.normal(keys[1], (input_dims, input_dims), jnp.float32) * 0.1
    b1 = jax.random.normal(keys[2], (1, input_dims), jnp.float32) * 0.1
    # fused head weights/biases (dense_num_ followed by each dense_cat_[key])
    w2 = jax.random.normal(keys[3], (input_dims, out_dim), jnp.float32) * 0.1
    b2 = jax.random.normal(keys[4], (1, out_dim), jnp.float32) * 0.1
    # gumbel noise sampled outside the kernel (deterministic from PRNGKey(0));
    # only the categorical columns of this buffer are consumed.
    gumbel = jax.random.gumbel(keys[5], (batch, out_dim), jnp.float32)

    # f32 matmul path: exact parity with the PyTorch module semantics.
    out = generator_forward(x, w1, b1, w2, b2, gumbel,
                            num_cont=num_cont, cat_dims=cat_dims, tau=tau)
    jax.block_until_ready(out)

    ref = generator_reference(x, w1, b1, w2, b2, gumbel,
                              num_cont=num_cont, cat_dims=cat_dims, tau=tau)
    assert out.shape == (batch, out_dim)
    assert jnp.allclose(out, ref, atol=1e-4, rtol=1e-4), "mismatch vs JAX reference"

    # bf16-operand path (v6e/v7x MXU peak); smoke test only — f32 accumulation
    # and f32 elementwise math are kept inside the kernel.
    out_bf16 = generator_forward(x, w1, b1, w2, b2, gumbel,
                                 num_cont=num_cont, cat_dims=cat_dims, tau=tau,
                                 matmul_dtype=jnp.bfloat16)
    jax.block_until_ready(out_bf16)
    assert out_bf16.shape == (batch, out_dim)
    assert bool(jnp.all(jnp.isfinite(out_bf16)))

    print("KERNEL_OK")
</pallas_src>

<mosaic_0001>
module attributes {stable_mosaic.version = 11 : i64} {
  func.func @_generator_kernel(%arg0: i32, %arg1: memref<8x128xf32, #tpu.memory_space<vmem>>, %arg2: memref<128x128xf32, #tpu.memory_space<vmem>>, %arg3: memref<1x128xf32, #tpu.memory_space<vmem>>, %arg4: memref<128x128xf32, #tpu.memory_space<vmem>>, %arg5: memref<1x128xf32, #tpu.memory_space<vmem>>, %arg6: memref<8x128xf32, #tpu.memory_space<vmem>>, %arg7: memref<128x128xf32, #tpu.memory_space<vmem>>, %arg8: memref<8x128xf32, #tpu.memory_space<vmem>>) attributes {dimension_semantics = [#tpu.dimension_semantics<parallel>], iteration_bounds = array<i64: 1>, scalar_prefetch = 0 : i64, scratch_operands = 0 : i64, tpu.core_type = #tpu.core_type<tc>, window_params = [{transform_indices = @transform_0, window_bounds = array<i64: 8, 128>}, {pipeline_mode = #tpu.pipeline_mode<synchronous>, transform_indices = @transform_1, window_bounds = array<i64: 128, 128>}, {pipeline_mode = #tpu.pipeline_mode<synchronous>, transform_indices = @transform_2, window_bounds = array<i64: 1, 128>}, {pipeline_mode = #tpu.pipeline_mode<synchronous>, transform_indices = @transform_3, window_bounds = array<i64: 128, 128>}, {pipeline_mode = #tpu.pipeline_mode<synchronous>, transform_indices = @transform_4, window_bounds = array<i64: 1, 128>}, {transform_indices = @transform_5, window_bounds = array<i64: 8, 128>}, {pipeline_mode = #tpu.pipeline_mode<synchronous>, transform_indices = @transform_6, window_bounds = array<i64: 128, 128>}, {transform_indices = @transform_7, window_bounds = array<i64: 8, 128>}]} {
    %c0 = arith.constant 0 : index
    %c0_0 = arith.constant 0 : index
    %0 = vector.load %arg1[%c0, %c0_0] : memref<8x128xf32, #tpu.memory_space<vmem>>, vector<8x128xf32>
    %c0_1 = arith.constant 0 : index
    %c0_2 = arith.constant 0 : index
    %1 = vector.load %arg2[%c0_1, %c0_2] : memref<128x128xf32, #tpu.memory_space<vmem>>, vector<128x128xf32>
    %cst = arith.constant dense<0.000000e+00> : vector<8x128xf32>
    %2 = tpu.matmul %0, %1, %cst {dimension_numbers = #tpu.dot_dimension_numbers<[1], [0], [0], [1], [0, 0, 1, 1], [], []>} : vector<8x128xf32>, vector<128x128xf32>, vector<8x128xf32> -> vector<8x128xf32>
    %c0_3 = arith.constant 0 : index
    %c0_4 = arith.constant 0 : index
    %3 = vector.load %arg3[%c0_3, %c0_4] : memref<1x128xf32, #tpu.memory_space<vmem>>, vector<1x128xf32>
    %4 = vector.broadcast %3 : vector<1x128xf32> to vector<8x128xf32>
    %5 = arith.addf %2, %4 : vector<8x128xf32>
    %cst_5 = arith.constant 0.000000e+00 : f32
    %6 = vector.broadcast %cst_5 : f32 to vector<8x128xf32>
    %7 = arith.maximumf %5, %6 : vector<8x128xf32>
    %c0_6 = arith.constant 0 : index
    %c0_7 = arith.constant 0 : index
    %8 = vector.load %arg4[%c0_6, %c0_7] : memref<128x128xf32, #tpu.memory_space<vmem>>, vector<128x128xf32>
    %cst_8 = arith.constant dense<0.000000e+00> : vector<8x128xf32>
    %9 = tpu.matmul %7, %8, %cst_8 {dimension_numbers = #tpu.dot_dimension_numbers<[1], [0], [0], [1], [0, 0, 1, 1], [], []>} : vector<8x128xf32>, vector<128x128xf32>, vector<8x128xf32> -> vector<8x128xf32>
    %c0_9 = arith.constant 0 : index
    %c0_10 = arith.constant 0 : index
    %10 = vector.load %arg5[%c0_9, %c0_10] : memref<1x128xf32, #tpu.memory_space<vmem>>, vector<1x128xf32>
    %11 = vector.broadcast %10 : vector<1x128xf32> to vector<8x128xf32>
    %12 = arith.addf %9, %11 : vector<8x128xf32>
    %13 = tpu.iota {dimensions = array<i32: 1>} : vector<1x128xi32>
    %c4_i32 = arith.constant 4 : i32
    %14 = vector.broadcast %c4_i32 : i32 to vector<1x128xi32>
    %15 = arith.cmpi slt, %13, %14 : vector<1x128xi32>
    %c4_i32_11 = arith.constant 4 : i32
    %16 = vector.broadcast %c4_i32_11 : i32 to vector<1x128xi32>
    %17 = arith.cmpi sge, %13, %16 : vector<1x128xi32>
    %c28_i32 = arith.constant 28 : i32
    %18 = vector.broadcast %c28_i32 : i32 to vector<1x128xi32>
    %19 = arith.cmpi slt, %13, %18 : vector<1x128xi32>
    %20 = arith.andi %17, %19 : vector<1x128xi1>
    %c0_12 = arith.constant 0 : index
    %c0_13 = arith.constant 0 : index
    %21 = vector.load %arg6[%c0_12, %c0_13] : memref<8x128xf32, #tpu.memory_space<vmem>>, vector<8x128xf32>
    %22 = arith.addf %12, %21 : vector<8x128xf32>
    %cst_14 = arith.constant 5.000000e+00 : f32
    %23 = vector.broadcast %cst_14 : f32 to vector<8x128xf32>
    %24 = arith.mulf %22, %23 : vector<8x128xf32>
    %cst_15 = arith.constant 0.000000e+00 : f32
    %25 = vector.broadcast %cst_15 : f32 to vector<8x128xf32>
    %c4_i32_16 = arith.constant 4 : i32
    %26 = vector.broadcast %c4_i32_16 : i32 to vector<1x128xi32>
    %27 = arith.cmpi sge, %13, %26 : vector<1x128xi32>
    %c12_i32 = arith.constant 12 : i32
    %28 = vector.broadcast %c12_i32 : i32 to vector<1x128xi32>
    %29 = arith.cmpi slt, %13, %28 : vector<1x128xi32>
    %30 = arith.andi %27, %29 : vector<1x128xi1>
    %cst_17 = arith.constant -1.000000e+30 : f32
    %31 = vector.shape_cast %30 : vector<1x128xi1> to vector<1x128xi1>
    %32 = vector.broadcast %31 : vector<1x128xi1> to vector<8x128xi1>
    %33 = vector.broadcast %cst_17 : f32 to vector<8x128xf32>
    %34 = arith.select %32, %24, %33 : vector<8x128xi1>, vector<8x128xf32>
    %cst_18 = arith.constant dense<0xFF800000> : vector<8xf32>
    %35 = vector.multi_reduction <maximumf>, %34, %cst_18 [1] : vector<8x128xf32> to vector<8xf32>
    %36 = vector.shape_cast %35 : vector<8xf32> to vector<8x1xf32>
    %37 = vector.shape_cast %30 : vector<1x128xi1> to vector<1x128xi1>
    %38 = vector.broadcast %37 : vector<1x128xi1> to vector<8x128xi1>
    %39 = vector.shape_cast %36 : vector<8x1xf32> to vector<8x1xf32>
    %40 = vector.broadcast %39 : vector<8x1xf32> to vector<8x128xf32>
    %41 = arith.select %38, %40, %25 : vector<8x128xi1>, vector<8x128xf32>
    %c12_i32_19 = arith.constant 12 : i32
    %42 = vector.broadcast %c12_i32_19 : i32 to vector<1x128xi32>
    %43 = arith.cmpi sge, %13, %42 : vector<1x128xi32>
    %c28_i32_20 = arith.constant 28 : i32
    %44 = vector.broadcast %c28_i32_20 : i32 to vector<1x128xi32>
    %45 = arith.cmpi slt, %13, %44 : vector<1x128xi32>
    %46 = arith.andi %43, %45 : vector<1x128xi1>
    %cst_21 = arith.constant -1.000000e+30 : f32
    %47 = vector.shape_cast %46 : vector<1x128xi1> to vector<1x128xi1>
    %48 = vector.broadcast %47 : vector<1x128xi1> to vector<8x128xi1>
    %49 = vector.broadcast %cst_21 : f32 to vector<8x128xf32>
    %50 = arith.select %48, %24, %49 : vector<8x128xi1>, vector<8x128xf32>
    %cst_22 = arith.constant dense<0xFF800000> : vector<8xf32>
    %51 = vector.multi_reduction <maximumf>, %50, %cst_22 [1] : vector<8x128xf32> to vector<8xf32>
    %52 = vector.shape_cast %51 : vector<8xf32> to vector<8x1xf32>
    %53 = vector.shape_cast %46 : vector<1x128xi1> to vector<1x128xi1>
    %54 = vector.broadcast %53 : vector<1x128xi1> to vector<8x128xi1>
    %55 = vector.shape_cast %52 : vector<8x1xf32> to vector<8x1xf32>
    %56 = vector.broadcast %55 : vector<8x1xf32> to vector<8x128xf32>
    %57 = arith.select %54, %56, %41 : vector<8x128xi1>, vector<8x128xf32>
    %58 = arith.subf %24, %57 : vector<8x128xf32>
    %cst_23 = arith.constant -1.000000e+30 : f32
    %59 = vector.shape_cast %20 : vector<1x128xi1> to vector<1x128xi1>
    %60 = vector.broadcast %59 : vector<1x128xi1> to vector<8x128xi1>
    %61 = vector.broadcast %cst_23 : f32 to vector<8x128xf32>
    %62 = arith.select %60, %58, %61 : vector<8x128xi1>, vector<8x128xf32>
    %63 = math.exp %62 : vector<8x128xf32>
    %c0_24 = arith.constant 0 : index
    %c0_25 = arith.constant 0 : index
    %64 = vector.load %arg7[%c0_24, %c0_25] : memref<128x128xf32, #tpu.memory_space<vmem>>, vector<128x128xf32>
    %cst_26 = arith.constant dense<0.000000e+00> : vector<8x128xf32>
    %65 = tpu.matmul %63, %64, %cst_26 {dimension_numbers = #tpu.dot_dimension_numbers<[1], [0], [0], [1], [0, 0, 1, 1], [], []>} : vector<8x128xf32>, vector<128x128xf32>, vector<8x128xf32> -> vector<8x128xf32>
    %cst_27 = arith.constant 1.000000e+00 : f32
    %66 = vector.shape_cast %20 : vector<1x128xi1> to vector<1x128xi1>
    %67 = vector.broadcast %66 : vector<1x128xi1> to vector<8x128xi1>
    %68 = vector.broadcast %cst_27 : f32 to vector<8x128xf32>
    %69 = arith.select %67, %65, %68 : vector<8x128xi1>, vector<8x128xf32>
    %70 = tpu.reciprocal %69 {approx = true} : vector<8x128xf32> -> vector<8x128xf32>
    %71 = arith.mulf %69, %70 : vector<8x128xf32>
    %cst_28 = arith.constant 2.000000e+00 : f32
    %72 = vector.broadcast %cst_28 : f32 to vector<8x128xf32>
    %73 = arith.subf %72, %71 : vector<8x128xf32>
    %74 = arith.mulf %70, %73 : vector<8x128xf32>
    %75 = arith.mulf %69, %74 : vector<8x128xf32>
    %cst_29 = arith.constant 2.000000e+00 : f32
    %76 = vector.broadcast %cst_29 : f32 to vector<8x128xf32>
    %77 = arith.subf %76, %75 : vector<8x128xf32>
    %78 = arith.mulf %74, %77 : vector<8x128xf32>
    %79 = arith.mulf %63, %78 : vector<8x128xf32>
    %cst_30 = arith.constant 0.000000e+00 : f32
    %80 = vector.broadcast %cst_30 : f32 to vector<8x128xf32>
    %81 = arith.maximumf %12, %80 : vector<8x128xf32>
    %82 = vector.shape_cast %15 : vector<1x128xi1> to vector<1x128xi1>
    %83 = vector.broadcast %82 : vector<1x128xi1> to vector<8x128xi1>
    %84 = arith.select %83, %81, %79 : vector<8x128xi1>, vector<8x128xf32>
    %c0_31 = arith.constant 0 : index
    %c0_32 = arith.constant 0 : index
    %85 = vector.load %arg8[%c0_31, %c0_32] : memref<8x128xf32, #tpu.memory_space<vmem>>, vector<8x128xf32>
    tpu.vector_store %arg8[%c0_31, %c0_32], %84 {strides = array<i32>} : memref<8x128xf32, #tpu.memory_space<vmem>>, vector<8x128xf32>,
    return
  }
  func.func @transform_0(%arg0: i32) -> (i32, i32) {
    %c0_i32 = arith.constant 0 : i32
    %c0_i32_0 = arith.constant 0 : i32
    return %arg0, %c0_i32 : i32, i32
  }
  func.func @transform_1(%arg0: i32) -> (i32, i32) {
    %c0_i32 = arith.constant 0 : i32
    %c0_i32_0 = arith.constant 0 : i32
    %c0_i32_1 = arith.constant 0 : i32
    return %c0_i32, %c0_i32_0 : i32, i32
  }
  func.func @transform_2(%arg0: i32) -> (i32, i32) {
    %c0_i32 = arith.constant 0 : i32
    %c0_i32_0 = arith.constant 0 : i32
    %c0_i32_1 = arith.constant 0 : i32
    return %c0_i32, %c0_i32_0 : i32, i32
  }
  func.func @transform_3(%arg0: i32) -> (i32, i32) {
    %c0_i32 = arith.constant 0 : i32
    %c0_i32_0 = arith.constant 0 : i32
    %c0_i32_1 = arith.constant 0 : i32
    return %c0_i32, %c0_i32_0 : i32, i32
  }
  func.func @transform_4(%arg0: i32) -> (i32, i32) {
    %c0_i32 = arith.constant 0 : i32
    %c0_i32_0 = arith.constant 0 : i32
    %c0_i32_1 = arith.constant 0 : i32
    return %c0_i32, %c0_i32_0 : i32, i32
  }
  func.func @transform_5(%arg0: i32) -> (i32, i32) {
    %c0_i32 = arith.constant 0 : i32
    %c0_i32_0 = arith.constant 0 : i32
    return %arg0, %c0_i32 : i32, i32
  }
  func.func @transform_6(%arg0: i32) -> (i32, i32) {
    %c0_i32 = arith.constant 0 : i32
    %c0_i32_0 = arith.constant 0 : i32
    %c0_i32_1 = arith.constant 0 : i32
    return %c0_i32, %c0_i32_0 : i32, i32
  }
  func.func @transform_7(%arg0: i32) -> (i32, i32) {
    %c0_i32 = arith.constant 0 : i32
    %c0_i32_0 = arith.constant 0 : i32
    return %arg0, %c0_i32 : i32, i32
  }
}

</mosaic_0001>

<bundles_post_ra>
// kernel: tpu_custom_call.1
= control target key start
LH: loop header
LB: loop body
LE: loop exit
PB: predicated region body
PF: predicated region fallthrough
CT: control target
= control target key end

     0   :  { %12 = vsyncpa [#allocation3], 0  ;;  %s564_s0 = inlined_call_operand.hbm [shape: f32[8,128], index: 0, kind: input, shape index: {}]   ;;  %s565_s1 = inlined_call_operand.hbm [shape: f32[128,128], index: 1, kind: input, shape index: {}]   ;;  %s566_s2 = inlined_call_operand.vmem [shape: f32[1,128], index: 2, kind: input, shape index: {}]   ;;  %s567_s3 = inlined_call_operand.hbm [shape: f32[128,128], index: 3, kind: input, shape index: {}]   ;;  %s568_s4 = inlined_call_operand.vmem [shape: f32[1,128], index: 4, kind: input, shape index: {}]   ;;  %s569_s5 = inlined_call_operand.hbm [shape: f32[8,128], index: 5, kind: input, shape index: {}]   ;;  %s570_s6 = inlined_call_operand.hbm [shape: f32[128,128], index: 6, kind: input, shape index: {}]   ;;  %s571_s7 = inlined_call_operand.hbm [shape: f32[8,128], index: 7, kind: output, shape index: {}]  }
   0x1   :  { %13 = vsyncpa [#allocation6], 0 }
   0x2   :  { %14 = vsyncpa [#allocation9], 0  ;;  %s31_s26 = sshll.u32 %s565_s1, 4  ;;  %s32_s26 = int_to_ptr.hbm [resolvable:$true] %s31_s26 }
   0x3   :  { %15 = vsyncpa [#allocation4], 0  ;;  %s449_s27 = smov [#allocation5]   ;;  %s62_s8 = sshll.u32 %s569_s5, 4  ;;  %s63_s8 = int_to_ptr.hbm [resolvable:$true] %s62_s8 }
   0x4   :  { %s33_s28 = sshll.u32 %s449_s27, 4  ;;  %s450_s9 = smov 128   ;;  %s34_s28 = int_to_ptr.vmem [resolvable:$true] %s33_s28 }
   0x5   :  { %s451_s10 = smov 8   ;;  %s452_s11 = smov [#allocation8]  }
   0x6   :  { %39 = dma.hbm_to_vmem [thread:$0]  %s32_s26, 2048, %s34_s28, [#allocation6], %s450_s9, %s450_s9, %s451_s10  }
   0x7   :  { %s64_s12 = sshll.u32 %s452_s11, 4  ;;  %s21_s15 = sshll.u32 %s564_s0, 4  ;;  %s65_s12 = int_to_ptr.vmem [resolvable:$true] %s64_s12  ;;  %s22_s15 = int_to_ptr.hbm [resolvable:$true] %s21_s15 }
   0x8   :  { %67 = dma.hbm_to_vmem [thread:$0]  %s63_s8, 128, %s65_s12, [#allocation9]  }
   0x9   :  { %s46_s17 = sshll.u32 %s567_s3, 4  ;;  %s453_s18 = smov [#allocation2]   ;;  %s47_s17 = int_to_ptr.hbm [resolvable:$true] %s46_s17 }
   0xa   :  { %s23_s19 = sshll.u32 %s453_s18, 4  ;;  %s454_s5 = smov [#allocation7]   ;;  %s24_s19 = int_to_ptr.vmem [resolvable:$true] %s23_s19 }
   0xb   :  { %26 = dma.hbm_to_vmem [thread:$0]  %s22_s15, 128, %s24_s19, [#allocation3]  }
   0xc   :  { %s48_s20 = sshll.u32 %s454_s5, 4  ;;  %s72_s23 = sshll.u32 %s570_s6, 4  ;;  %s49_s20 = int_to_ptr.vmem [resolvable:$true] %s48_s20  ;;  %s73_s23 = int_to_ptr.hbm [resolvable:$true] %s72_s23 }
   0xd   :  { %54 = dma.hbm_to_vmem [thread:$0]  %s47_s17, 2048, %s49_s20, [#allocation6], %s450_s9, %s450_s9, %s451_s10  }
   0xe   :  { %s455_s0 = smov [#allocation10]  }
   0xf   :  { %s74_s24 = sshll.u32 %s455_s0, 4  ;;  %s75_s24 = int_to_ptr.vmem [resolvable:$true] %s74_s24 }
  0x10   :  { %80 = dma.hbm_to_vmem [thread:$0]  %s73_s23, 2048, %s75_s24, [#allocation9], %s450_s9, %s450_s9, %s451_s10  }
  0x11   :  { %441 = dma.done.wait [#allocation3], 128  }
  0x12   :  { %442 = vsyncadd [#allocation3], 4294967168 }
  0x13   :  { %443 = dma.done.wait [#allocation6], 4096  }
  0x14   :  { %444 = vsyncadd [#allocation6], 4294963200 }
  0x15   :  { %445 = dma.done.wait [#allocation9], 2176  }
  0x16   :  { %446 = vsyncadd [#allocation9], 4294965120  ;;  %v117_v0 = vld [vmem:[#allocation5 + $0x78] sm:$0xff]  ;;  %v116_v1 = vld [vmem:[#allocation5 + $0x70] sm:$0xff]  ;;  %v183_v37 = vlaneseq  ;;  %s271_s29 = sshll.u32 %s571_s7, 4  ;;  %s272_s29 = int_to_ptr.hbm [resolvable:$true] %s271_s29 }
  0x17   :  { %122 = vmatpush.msra.mxu0 %v117_v0  ;;  %v115_v2 = vld [vmem:[#allocation5 + $0x68] sm:$0xff]  ;;  %v114_v3 = vld [vmem:[#allocation5 + $0x60] sm:$0xff]  ;;  %v158_v4 = vld [vmem:[#allocation7 + $0x78] sm:$0xff] }
  0x18   :  { %v113_v5 = vld [vmem:[#allocation5 + $0x58] sm:$0xff]  ;;  %163 = vmatpush.msra.mxu1 %v158_v4  ;;  %v157_v6 = vld [vmem:[#allocation7 + $0x70] sm:$0xff]  ;;  %v156_v7 = vld [vmem:[#allocation7 + $0x68] sm:$0xff]  ;;  %v515_v38 = vand.u32 127, %v183_v37 }
  0x19   :  { %123 = vmatpush.msra.mxu0 %v116_v1  ;;  %v112_v8 = vld [vmem:[#allocation5 + $0x50] sm:$0xff]  ;;  %v155_v9 = vld [vmem:[#allocation7 + $0x60] sm:$0xff]  ;;  %v111_v10 = vld [vmem:[#allocation5 + $0x48] sm:$0xff] }
  0x1a   :  { %164 = vmatpush.msra.mxu1 %v157_v6  ;;  %v154_v11 = vld [vmem:[#allocation7 + $0x58] sm:$0xff]  ;;  %v110_v12 = vld [vmem:[#allocation5 + $0x40] sm:$0xff]  ;;  %v153_v13 = vld [vmem:[#allocation7 + $0x50] sm:$0xff]  ;;  %vm186_vm0 = vcmp.ge.s32.totalorder %v515_v38, 4  ;;  %vm187_vm1 = vcmp.lt.s32.totalorder %v515_v38, 28  ;;  %vm192_vm3 = vcmp.lt.s32.totalorder %v515_v38, 12 }
  0x1b   :  { %124 = vmatpush.msra.mxu0 %v115_v2  ;;  %v109_v14 = vld [vmem:[#allocation5 + $0x38] sm:$0xff]  ;;  %v152_v15 = vld [vmem:[#allocation7 + $0x48] sm:$0xff]  ;;  %v108_v16 = vld [vmem:[#allocation5 + $0x30] sm:$0xff]  ;;  %vm200_vm5 = vcmp.ge.s32.totalorder %v515_v38, 12  ;;  %vm185_vm7 = vcmp.lt.s32.totalorder %v515_v38, 4 }
  0x1c   :  { %165 = vmatpush.msra.mxu1 %v156_v7  ;;  %v151_v17 = vld [vmem:[#allocation7 + $0x40] sm:$0xff]  ;;  %v107_v18 = vld [vmem:[#allocation5 + $0x28] sm:$0xff]  ;;  %v150_v19 = vld [vmem:[#allocation7 + $0x38] sm:$0xff] }
  0x1d   :  { %125 = vmatpush.msra.mxu0 %v114_v3  ;;  %v106_v20 = vld [vmem:[#allocation5 + $0x20] sm:$0xff]  ;;  %v149_v21 = vld [vmem:[#allocation7 + $0x30] sm:$0xff]  ;;  %v105_v22 = vld [vmem:[#allocation5 + $0x18] sm:$0xff] }
  0x1e   :  { %166 = vmatpush.msra.mxu1 %v155_v9  ;;  %v148_v23 = vld [vmem:[#allocation7 + $0x28] sm:$0xff]  ;;  %v104_v24 = vld [vmem:[#allocation5 + $0x10] sm:$0xff]  ;;  %v147_v25 = vld [vmem:[#allocation7 + $0x20] sm:$0xff] }
  0x1f   :  { %126 = vmatpush.msra.mxu0 %v113_v5  ;;  %v103_v26 = vld [vmem:[#allocation5 + $0x8] sm:$0xff]  ;;  %v146_v27 = vld [vmem:[#allocation7 + $0x18] sm:$0xff]  ;;  %v102_v28 = vld [vmem:[#allocation5] sm:$0xff] }
  0x20   :  { %167 = vmatpush.msra.mxu1 %v154_v11  ;;  %v101_v29 = vld [vmem:[#allocation2] sm:$0xff]  ;;  %v145_v30 = vld [vmem:[#allocation7 + $0x10] sm:$0xff]  ;;  %v144_v31 = vld [vmem:[#allocation7 + $0x8] sm:$0xff] }
  0x21   :  { %127 = vmatpush.msra.mxu0 %v112_v8  ;;  %v143_v32 = vld [vmem:[#allocation7] sm:$0xff]  ;;  %v291_v33 = vld [vmem:[%s566_s2] ss:$0 sm:$0xff]  ;;  %vm523_vm2 = vmand %vm186_vm0, %vm187_vm1 }
  0x22   :  { %168 = vmatpush.msra.mxu1 %v153_v13  ;;  %v229_v40 = vld [vmem:[#allocation10 + $0x78] sm:$0xff]  ;;  %v228_v41 = vld [vmem:[#allocation10 + $0x70] sm:$0xff]  ;;  %v227_v42 = vld [vmem:[#allocation10 + $0x68] sm:$0xff] }
  0x23   :  { %128 = vmatpush.msra.mxu0 %v111_v10  ;;  %230 = vmatpush.msra.mxu2 %v229_v40  ;;  %v226_v43 = vld [vmem:[#allocation10 + $0x60] sm:$0xff]  ;;  %v225_v44 = vld [vmem:[#allocation10 + $0x58] sm:$0xff]  ;;  %v292_v45 = vld [vmem:[%s568_s4] ss:$0 sm:$0xff]  ;;  %s456_s4 = smov [#allocation11]  }
  0x24   :  { %169 = vmatpush.msra.mxu1 %v152_v15  ;;  %v189_v47 = vld [vmem:[#allocation8] sm:$0xff]  ;;  %vm536_vm4 = vmand %vm186_vm0, %vm192_vm3  ;;  %v224_v55 = vld [vmem:[#allocation10 + $0x50] sm:$0xff]  ;;  %s269_s26 = sshll.u32 %s456_s4, 4  ;;  %s270_s26 = int_to_ptr.vmem [resolvable:$true] %s269_s26 }
  0x25   :  { %129 = vmatpush.msra.mxu0 %v110_v12  ;;  %231 = vmatpush.msra.mxu2 %v228_v41  ;;  %vm545_vm6 = vmand %vm200_vm5, %vm187_vm1  ;;  %v223_v56 = vld [vmem:[#allocation10 + $0x48] sm:$0xff]  ;;  %v222_v57 = vld [vmem:[#allocation10 + $0x40] sm:$0xff] }
  0x26   :  { %170 = vmatpush.msra.mxu1 %v151_v17  ;;  %v221_v58 = vld [vmem:[#allocation10 + $0x38] sm:$0xff]  ;;  %v220_v59 = vld [vmem:[#allocation10 + $0x30] sm:$0xff]  ;;  %v219_v60 = vld [vmem:[#allocation10 + $0x28] sm:$0xff] }
  0x27   :  { %130 = vmatpush.msra.mxu0 %v109_v14  ;;  %232 = vmatpush.msra.mxu2 %v227_v42  ;;  %v218_v61 = vld [vmem:[#allocation10 + $0x20] sm:$0xff]  ;;  %v217_v62 = vld [vmem:[#allocation10 + $0x18] sm:$0xff]  ;;  %v216_v63 = vld [vmem:[#allocation10 + $0x10] sm:$0xff] }
  0x28   :  { %171 = vmatpush.msra.mxu1 %v150_v19  ;;  %v215_v0 = vld [vmem:[#allocation10 + $0x8] sm:$0xff]  ;;  %v214_v1 = vld [vmem:[#allocation10] sm:$0xff] }
  0x29   :  { %131 = vmatpush.msra.mxu0 %v108_v16  ;;  %233 = vmatpush.msra.mxu2 %v226_v43 }
  0x2a   :  { %172 = vmatpush.msra.mxu1 %v149_v21 }
  0x2b   :  { %132 = vmatpush.msra.mxu0 %v107_v18  ;;  %234 = vmatpush.msra.mxu2 %v225_v44 }
  0x2c   :  { %173 = vmatpush.msra.mxu1 %v148_v23 }
  0x2d   :  { %133 = vmatpush.msra.mxu0 %v106_v20  ;;  %235 = vmatpush.msra.mxu2 %v224_v55 }
  0x2e   :  { %174 = vmatpush.msra.mxu1 %v147_v25 }
  0x2f   :  { %134 = vmatpush.msra.mxu0 %v105_v22  ;;  %236 = vmatpush.msra.mxu2 %v223_v56 }
  0x30   :  { %175 = vmatpush.msra.mxu1 %v146_v27 }
  0x31   :  { %135 = vmatpush.msra.mxu0 %v104_v24  ;;  %237 = vmatpush.msra.mxu2 %v222_v57 }
  0x32   :  { %176 = vmatpush.msra.mxu1 %v145_v30 }
  0x33   :  { %136 = vmatpush.msra.mxu0 %v103_v26  ;;  %238 = vmatpush.msra.mxu2 %v221_v58 }
  0x34   :  { %177 = vmatpush.msra.mxu1 %v144_v31 }
  0x35   :  { %137 = vmatpush.msra.mxu0 %v102_v28  ;;  %239 = vmatpush.msra.mxu2 %v220_v59 }
  0x36   :  { %138 = vmatmul.f32.vlgmr.msra.gmra.mxu0 %v101_v29  ;;  %178 = vmatpush.msra.mxu1 %v143_v32 }
  0x37   :  { %240 = vmatpush.msra.mxu2 %v219_v60 }
  0x39   :  { %241 = vmatpush.msra.mxu2 %v218_v61 }
  0x3b   :  { %242 = vmatpush.msra.mxu2 %v217_v62 }
  0x3d   :  { %243 = vmatpush.msra.mxu2 %v216_v63 }
  0x3f   :  { %244 = vmatpush.msra.mxu2 %v215_v0 }
  0x41   :  { %245 = vmatpush.msra.mxu2 %v214_v1 }
  0xb3   :  { %v139_v34 = vpop.f32.mrf.mxu0 }
  0xb4   :  { %v140_v35 = vadd.f32 %v291_v33, %v139_v34 }
  0xb6   :  { %v142_v36 = vmax.f32 %v140_v35, 0.0 }
  0xb8   :  { %179 = vmatmul.f32.vlgmr.msra.gmra.mxu1 %v142_v36 }
 0x135   :  { %v180_v46 = vpop.f32.mrf.mxu1 }
 0x136   :  { %v530_v48 = vadd.f32 %v292_v45, %v180_v46 }
 0x138   :  { %v190_v49 = vadd.f32 %v189_v47, %v530_v48  ;;  %v259_v19 = vmax.f32 %v530_v48, 0.0 }
 0x13a   :  { %v191_v51 = vmul.f32 5.0, %v190_v49 }
 0x13c   :  { %v196_v52 = vsel %vm536_vm4, %v191_v51, -1e+30  ;;  %v204_v54 = vsel %vm545_vm6, %v191_v51, -1e+30 }
 0x13d   :  { %197 = vmax.xlane.f32.xlu0 %v196_v52 }
 0x145   :  { %205 = vmax.xlane.f32.xlu0 %v204_v54 }
 0x1b0   :  { %v198_v2 = vpop.xlane.xlu0 %197 }
 0x1b1   :  { %v199_v3 = vsel %vm536_vm4, %v198_v2, 0.0 }
 0x1b8   :  { %v206_v4 = vpop.xlane.xlu0 %205 }
 0x1b9   :  { %v207_v5 = vsel %vm545_vm6, %v206_v4, %v199_v3 }
 0x1ba   :  { %v208_v6 = vsub.f32 %v191_v51, %v207_v5 }
 0x1bc   :  { %v211_v7 = vsel %vm523_vm2, %v208_v6, -1e+30 }
 0x1bd   :  { %v212_v8 = vmul.f32 1.442695, %v211_v7 }
 0x1bf   :  { %293 = vpow2.f32 %v212_v8 }
 0x1c5   :  { %v294_v9 = vpop.eup %293 }
 0x1c6   :  { %246 = vmatmul.f32.vlgmr.msra.gmra.mxu2 %v294_v9 }
 0x249   :  { %v247_v10 = vpop.f32.mrf.mxu2 }
 0x24a   :  { %v250_v11 = vsel %vm523_vm2, %v247_v10, 1.0 }
 0x24b   :  { %295 = vrcp.f32 %v250_v11 }
 0x251   :  { %v296_v12 = vpop.eup %295 }
 0x252   :  { %v252_v13 = vmul.f32 %v296_v12, %v250_v11 }
 0x254   :  { %v253_v14 = vsub.f32 2.0, %v252_v13 }
 0x256   :  { %v254_v15 = vmul.f32 %v296_v12, %v253_v14 }
 0x258   :  { %v255_v16 = vmul.f32 %v254_v15, %v250_v11 }
 0x25a   :  { %v256_v17 = vsub.f32 2.0, %v255_v16 }
 0x25c   :  { %v257_v18 = vmul.f32 %v256_v17, %v254_v15 }
 0x25e   :  { %v258_v20 = vmul.f32 %v294_v9, %v257_v18 }
 0x260   :  { %v262_v21 = vsel %vm185_vm7, %v259_v19, %v258_v20 }
 0x261   :  { %263 = vst [vmem:[#allocation11] sm:$0xff] %v262_v21 }
 0x262   :  { %274 = dma.vmem_to_hbm [thread:$0]  %s270_s26, 128, %s272_s29, [#allocation4]  }
 0x263   :  { %447 = dma.done.wait [#allocation4], 128  }
 0x264   :  { %448 = vsyncadd [#allocation4], 4294967168 }
 0x265   :  { %279 = vsyncpa [#allocation3], 1 }
 0x266   :  { %280 = vsyncpa [#allocation6], 1 }
 0x267   :  { %281 = vsyncpa [#allocation9], 1 }
 0x268   :  { %282 = vsyncpa [#allocation4], 1 }

</bundles_post_ra>
